<compile_context>
chip_gen: v7x
topology: tpu7x:2x2x1
jax: 0.10.0
libtpu: 0.0.40
codegen_flags: <defaults>
</compile_context>

<pallas_src>
import jax
import jax.numpy as jnp
from jax import lax
from jax.experimental import pallas as pl
from jax.experimental.pallas import tpu as pltpu

LN_EPS = 1e-5                      # PyTorch nn.LayerNorm default
MATMUL_WEIGHT_DTYPE = jnp.float32  # set to jnp.bfloat16 on v6e/v7x at large H

TASK_CONFIG = {
    "return_prediction":     {"type": "regression",     "output_dim": 1},
    "volatility_prediction": {"type": "regression",     "output_dim": 1},
    "trend_classification":  {"type": "classification", "output_dim": 3},
    "risk_assessment":       {"type": "ordinal",        "output_dim": 5},
    "anomaly_detection":     {"type": "binary",         "output_dim": 1},
}


def _round_up(v, m):
    return ((v + m - 1) // m) * m


# ---------------------------------------------------------------------------
# Output-slab layout.  Raw (2nd-layer matmul) columns land directly at their
# final slab positions; only derived columns are overwritten in the kernel.
# ---------------------------------------------------------------------------
def _build_layout():
    layout, raw_cols, sigmoid_cols = {}, {}, []
    col = 0
    for name, cfg in TASK_CONFIG.items():
        t, O = cfg["type"], cfg["output_dim"]
        if t == "regression":
            layout[name] = {"value": (col, col + O)}
            raw_cols[name] = (col, O)
            col += O
        elif t == "binary":
            layout[name] = {"value": (col, col + O)}
            raw_cols[name] = (col, O)
            sigmoid_cols.append((col, col + O))          # sigmoid in place
            col += O
        elif t == "classification":
            layout[name] = {"logits": (col, col + O),
                            "probabilities": (col + O, col + 2 * O)}
            raw_cols[name] = (col, O)                    # logits land in place
            col += 2 * O
        else:  # ordinal
            layout[name] = {"cumulative_probabilities": (col, col + O - 1),
                            "probabilities": (col + O - 1, col + 2 * O - 1),
                            "predicted_class": (col + 2 * O - 1, col + 2 * O)}
            raw_cols[name] = (col, O - 1)                # thresholds -> cum slot
            sigmoid_cols.append((col, col + O - 1))      # sigmoid in place
            col += 2 * O
    return layout, raw_cols, sigmoid_cols, col


SLAB_LAYOUT, RAW_COLS, SIGMOID_COLS, SLAB_USED = _build_layout()
SLAB_WIDTH = max(128, _round_up(SLAB_USED, 128))         # lane-dense output


# ---------------------------------------------------------------------------
# Single-buffering capability probe (pl.Buffered(1) on invariant operands)
# ---------------------------------------------------------------------------
_UNRESOLVED = object()
_WEIGHT_PIPELINE_MODE = _UNRESOLVED


def _probe_kernel(w_ref, o_ref):
    o_ref[...] = w_ref[...] + pl.program_id(0).astype(jnp.float32)


def _weight_pipeline_mode():
    """pl.Buffered(1) if this JAX/Mosaic build supports single-buffered,
    grid-invariant operands (halves their VMEM footprint); else None."""
    global _WEIGHT_PIPELINE_MODE
    if _WEIGHT_PIPELINE_MODE is not _UNRESOLVED:
        return _WEIGHT_PIPELINE_MODE
    mode = None
    try:
        w = jnp.arange(8 * 128, dtype=jnp.float32).reshape(8, 128)
        out = pl.pallas_call(
            _probe_kernel,
            out_shape=jax.ShapeDtypeStruct((16, 128), jnp.float32),
            grid=(2,),
            in_specs=[pl.BlockSpec((8, 128), lambda i: (0, 0),
                                   pipeline_mode=pl.Buffered(1))],
            out_specs=pl.BlockSpec((8, 128), lambda i: (i, 0)),
        )(w)
        out = jax.block_until_ready(out)
        ok = bool(jnp.allclose(out[:8], w)) and bool(jnp.allclose(out[8:], w + 1.0))
        if ok:
            mode = pl.Buffered(1)
    except Exception:
        mode = None            # fall back to default double buffering
    _WEIGHT_PIPELINE_MODE = mode
    return mode


# ---------------------------------------------------------------------------
# Fused kernel: feature extractor + all task heads in one body
# ---------------------------------------------------------------------------
def _layernorm(h, gamma, beta):
    # single-pass statistics: sum and sum of squares, rsqrt on the EUP
    inv_n = 1.0 / h.shape[-1]
    mean = jnp.sum(h, axis=-1, keepdims=True) * inv_n
    var = jnp.maximum(jnp.sum(h * h, axis=-1, keepdims=True) * inv_n
                      - mean * mean, 0.0)
    return (h - mean) * lax.rsqrt(var + LN_EPS) * gamma + beta


def fused_kernel(x_ref, fw1, fw2, hw1, hw2, vec_ref, out_ref):
    H = fw1.shape[1]
    HH5 = hw1.shape[1]
    W = out_ref.shape[1]

    # packed bias / LayerNorm-scale rows (one operand instead of eight)
    fb1, fg1, fbe1 = vec_ref[0:1, :H], vec_ref[1:2, :H], vec_ref[2:3, :H]
    fb2, fg2, fbe2 = vec_ref[3:4, :H], vec_ref[4:5, :H], vec_ref[5:6, :H]
    hb1 = vec_ref[6:7, :HH5]
    hb2 = vec_ref[7:8, :W]

    # ---- shared feature extractor: Linear -> LN -> ReLU -> Linear -> LN -> ReLU
    x = x_ref[...]
    h = jnp.dot(x.astype(fw1.dtype), fw1[...],
                preferred_element_type=jnp.float32) + fb1
    h = jnp.maximum(_layernorm(h, fg1, fbe1), 0.0)
    h = jnp.dot(h.astype(fw2.dtype), fw2[...],
                preferred_element_type=jnp.float32) + fb2
    feats = jnp.maximum(_layernorm(h, fg2, fbe2), 0.0)

    # ---- all heads fused: one (H, 5*Hh) matmul + ReLU, one (5*Hh, 128) matmul
    # whose zero-padded columns place every raw output at its final slab lane.
    ha = jnp.maximum(
        jnp.dot(feats.astype(hw1.dtype), hw1[...],
                preferred_element_type=jnp.float32) + hb1, 0.0)
    raw = jnp.dot(ha.astype(hw2.dtype), hw2[...],
                  preferred_element_type=jnp.float32) + hb2        # (TB, 128)

    # in-place sigmoid on the ordinal-threshold and binary-logit lanes
    lane = lax.broadcasted_iota(jnp.int32, raw.shape, 1)
    sig_mask = jnp.zeros(raw.shape, jnp.bool_)
    for a, b in SIGMOID_COLS:
        sig_mask = jnp.logical_or(sig_mask, (lane >= a) & (lane < b))
    row = jnp.where(sig_mask, jax.nn.sigmoid(raw), raw)

    # one dense, unmasked 128-lane store (regressions, logits, cum-probs,
    # anomaly prob are already in place)
    out_ref[...] = row

    # derived columns only: softmax probs, ordinal probs + predicted class
    TB = x.shape[0]
    for name, cfg in TASK_CONFIG.items():                 # static Python unroll
        t, O = cfg["type"], cfg["output_dim"]
        ent = SLAB_LAYOUT[name]
        if t == "classification":
            la, lb = ent["logits"]
            pa, pb = ent["probabilities"]
            logits = raw[:, la:lb]
            m = jnp.max(logits, axis=-1, keepdims=True)
            e = jnp.exp(logits - m)
            out_ref[:, pa:pb] = e / jnp.sum(e, axis=-1, keepdims=True)
        elif t == "ordinal":
            ca, cb = ent["cumulative_probabilities"]
            pa, pb = ent["probabilities"]
            ka, kb = ent["predicted_class"]
            cum = row[:, ca:cb]                           # already sigmoided
            ones = jnp.ones((TB, 1), jnp.float32)
            zeros = jnp.zeros((TB, 1), jnp.float32)
            # probs = concat([1, cum]) - concat([cum, 0])
            probs = (jnp.concatenate([ones, cum], axis=-1)
                     - jnp.concatenate([cum, zeros], axis=-1))     # (TB, O)
            out_ref[:, pa:pb] = probs
            cidx = lax.broadcasted_iota(jnp.int32, probs.shape, 1)
            maxv = jnp.max(probs, axis=-1, keepdims=True)
            pred = jnp.min(jnp.where(probs == maxv, cidx, O),
                           axis=-1, keepdims=True)        # first argmax
            out_ref[:, ka:kb] = pred.astype(jnp.float32)


# ---------------------------------------------------------------------------
# Host-side parameter construction & packing
# ---------------------------------------------------------------------------
def init_params(key, input_dim, hidden_dim):
    """Per-layer params matching the torch module structure."""
    Hh = hidden_dim // 2
    keys = iter(jax.random.split(key, 64))

    def lin(din, dout):
        w = jax.random.normal(next(keys), (din, dout), jnp.float32) * 0.05
        b = jax.random.normal(next(keys), (1, dout), jnp.float32) * 0.05
        return w, b

    p = {}
    p["fe_w1"], p["fe_b1"] = lin(input_dim, hidden_dim)
    p["fe_g1"] = jnp.ones((1, hidden_dim), jnp.float32)
    p["fe_be1"] = jnp.zeros((1, hidden_dim), jnp.float32)
    p["fe_w2"], p["fe_b2"] = lin(hidden_dim, hidden_dim)
    p["fe_g2"] = jnp.ones((1, hidden_dim), jnp.float32)
    p["fe_be2"] = jnp.zeros((1, hidden_dim), jnp.float32)

    for name, cfg in TASK_CONFIG.items():
        O = cfg["output_dim"]
        if cfg["type"] == "ordinal":
            p[f"{name}_wf"], p[f"{name}_bf"] = lin(hidden_dim, Hh)
            # O-1 threshold predictors fused as one (Hh, O-1) matrix
            p[f"{name}_wt"], p[f"{name}_bt"] = lin(Hh, O - 1)
        else:
            p[f"{name}_w1"], p[f"{name}_b1"] = lin(hidden_dim, Hh)
            p[f"{name}_w2"], p[f"{name}_b2"] = lin(Hh, O)
    return p


def pack_params(p, matmul_dtype=MATMUL_WEIGHT_DTYPE):
    """Done ONCE on the host: concatenate head first layers, build the
    slab-positioned block-diagonal second layer, and pack all bias/scale
    vectors into one (8, Wpad) block."""
    H = p["fe_w1"].shape[1]
    Hh = H // 2
    names = list(TASK_CONFIG)
    n_heads = len(names)
    HH5 = n_heads * Hh

    w1_list, b1_list = [], []
    h_w2 = jnp.zeros((HH5, SLAB_WIDTH), jnp.float32)
    h_b2 = jnp.zeros((1, SLAB_WIDTH), jnp.float32)
    for i, name in enumerate(names):
        cfg = TASK_CONFIG[name]
        if cfg["type"] == "ordinal":
            w1, b1 = p[f"{name}_wf"], p[f"{name}_bf"]
            w2, b2 = p[f"{name}_wt"], p[f"{name}_bt"]
        else:
            w1, b1 = p[f"{name}_w1"], p[f"{name}_b1"]
            w2, b2 = p[f"{name}_w2"], p[f"{name}_b2"]
        w1_list.append(w1)
        b1_list.append(b1)
        a, n = RAW_COLS[name]
        h_w2 = h_w2.at[i * Hh:(i + 1) * Hh, a:a + n].set(w2)
        h_b2 = h_b2.at[:, a:a + n].set(b2)

    h_w1 = jnp.concatenate(w1_list, axis=1)               # (H, 5*Hh)
    h_b1 = jnp.concatenate(b1_list, axis=1)               # (1, 5*Hh)

    # pack the eight (1, *) vectors into one lane-aligned block
    w_pad = _round_up(max(H, HH5, SLAB_WIDTH), 128)
    rows = [p["fe_b1"], p["fe_g1"], p["fe_be1"],
            p["fe_b2"], p["fe_g2"], p["fe_be2"], h_b1, h_b2]
    bias_pack = jnp.zeros((8, w_pad), jnp.float32)
    for r, v in enumerate(rows):
        bias_pack = bias_pack.at[r:r + 1, :v.shape[1]].set(v)

    return {"fe_w1": p["fe_w1"].astype(matmul_dtype),
            "fe_w2": p["fe_w2"].astype(matmul_dtype),
            "h_w1": h_w1.astype(matmul_dtype),
            "h_w2": h_w2.astype(matmul_dtype),
            "bias_pack": bias_pack}


_WEIGHT_ORDER = ("fe_w1", "fe_w2", "h_w1", "h_w2", "bias_pack")


# ---------------------------------------------------------------------------
# Batch tiling, pallas_call wrapper, slab unpacking
# ---------------------------------------------------------------------------
def _pick_batch_tile(B):
    if B <= 8:
        return 8
    # >= 2 grid steps once B >= 16 so the "parallel" batch axis shards across
    # v7x's two TensorCores; cap at 512 rows (amortizes the ~0.35us/step
    # overhead, keeps activation VMEM bounded across v5e/v6e/v7x).
    tb = _round_up(-(-B // 2), 8)
    return max(8, min(tb, 512))


def _unpack_slab(slab):
    preds = {}
    for name, cfg in TASK_CONFIG.items():
        t, ent = cfg["type"], SLAB_LAYOUT[name]
        if t in ("regression", "binary"):
            a, b = ent["value"]
            preds[name] = slab[:, a:b]
        elif t == "classification":
            la, lb = ent["logits"]
            pa, pb = ent["probabilities"]
            preds[name] = {"logits": slab[:, la:lb],
                           "probabilities": slab[:, pa:pb]}
        else:  # ordinal
            ca, cb = ent["cumulative_probabilities"]
            pa, pb = ent["probabilities"]
            ka, _ = ent["predicted_class"]
            preds[name] = {
                "cumulative_probabilities": slab[:, ca:cb],
                "probabilities": slab[:, pa:pb],
                # TODO(synk): torch returns int64; int32 here (TPU-native).
                "predicted_class": slab[:, ka].astype(jnp.int32),
            }
    return preds


def financial_multi_task_forward(x, packed, tasks=None):
    B, D = x.shape
    H = packed["fe_w1"].shape[1]
    HH5 = packed["h_w1"].shape[1]

    TB = _pick_batch_tile(B)
    n_tiles = pl.cdiv(B, TB)
    B_pad = n_tiles * TB
    if B_pad != B:
        x = jnp.pad(x, ((0, B_pad - B), (0, 0)))

    weights = [packed[k] for k in _WEIGHT_ORDER]
    mode = _weight_pipeline_mode()

    def _invariant(arr):
        idx = lambda i: (0,) * arr.ndim
        if mode is None:
            return pl.BlockSpec(arr.shape, idx)
        return pl.BlockSpec(arr.shape, idx, pipeline_mode=mode)

    cost = pl.CostEstimate(
        flops=int(2 * B_pad * (D * H + H * H + H * HH5 + HH5 * SLAB_WIDTH)),
        transcendentals=int(B_pad * (SLAB_WIDTH + 8)),
        bytes_accessed=int(4 * B_pad * (D + SLAB_WIDTH)
                           + sum(w.size * w.dtype.itemsize for w in weights)),
    )

    slab = pl.pallas_call(
        fused_kernel,
        out_shape=jax.ShapeDtypeStruct((B_pad, SLAB_WIDTH), jnp.float32),
        grid=(n_tiles,),
        in_specs=[pl.BlockSpec((TB, D), lambda i: (i, 0))]
                 + [_invariant(w) for w in weights],
        out_specs=pl.BlockSpec((TB, SLAB_WIDTH), lambda i: (i, 0)),
        compiler_params=pltpu.CompilerParams(
            dimension_semantics=("parallel",)),
        cost_estimate=cost,
    )(x, *weights)

    preds = _unpack_slab(slab[:B])
    if tasks is not None:
        preds = {k: v for k, v in preds.items() if k in tasks}
    return preds


# ---------------------------------------------------------------------------
# Pure-JAX reference (PyTorch semantics, un-packed params)
# ---------------------------------------------------------------------------
def _ref_forward(x, p):
    def ln(h):
        m = h.mean(-1, keepdims=True)
        v = ((h - m) ** 2).mean(-1, keepdims=True)
        return (h - m) / jnp.sqrt(v + LN_EPS)

    f = jnp.maximum(ln(x @ p["fe_w1"] + p["fe_b1"]) * p["fe_g1"] + p["fe_be1"], 0.0)
    f = jnp.maximum(ln(f @ p["fe_w2"] + p["fe_b2"]) * p["fe_g2"] + p["fe_be2"], 0.0)
    out = {}
    for name, cfg in TASK_CONFIG.items():
        t = cfg["type"]
        if t == "ordinal":
            h = jnp.maximum(f @ p[f"{name}_wf"] + p[f"{name}_bf"], 0.0)
            cum = jax.nn.sigmoid(h @ p[f"{name}_wt"] + p[f"{name}_bt"])
            B = x.shape[0]
            probs = jnp.concatenate([jnp.ones((B, 1)), cum], 1) - \
                    jnp.concatenate([cum, jnp.zeros((B, 1))], 1)
            out[name] = {"cumulative_probabilities": cum, "probabilities": probs,
                         "predicted_class": jnp.argmax(probs, 1).astype(jnp.int32)}
        else:
            h = jnp.maximum(f @ p[f"{name}_w1"] + p[f"{name}_b1"], 0.0)
            y = h @ p[f"{name}_w2"] + p[f"{name}_b2"]
            if t == "classification":
                out[name] = {"logits": y, "probabilities": jax.nn.softmax(y, axis=1)}
            elif t == "binary":
                out[name] = jax.nn.sigmoid(y)
            else:
                out[name] = y
    return out


# ---------------------------------------------------------------------------
if __name__ == "__main__":
    # B=12 deliberately exercises the cdiv + pad path and a 2-step grid.
    BATCH, INPUT_DIM, HIDDEN_DIM = 12, 32, 64

    key = jax.random.PRNGKey(0)
    kx, kp = jax.random.split(key)
    x = jax.random.normal(kx, (BATCH, INPUT_DIM), jnp.float32)
    params = init_params(kp, INPUT_DIM, HIDDEN_DIM)
    packed = pack_params(params)            # host-side packing, done once

    _weight_pipeline_mode()                 # resolve Buffered(1) support once

    fwd = jax.jit(financial_multi_task_forward)
    preds = jax.block_until_ready(fwd(x, packed))
    ref = jax.block_until_ready(_ref_forward(x, params))

    for name in TASK_CONFIG:
        a, b = preds[name], ref[name]
        if isinstance(a, dict):
            for k in b:
                av = jnp.asarray(a[k], jnp.float32)
                bv = jnp.asarray(b[k], jnp.float32)
                assert jnp.allclose(av, bv, atol=1e-4, rtol=1e-4), \
                    (name, k, float(jnp.max(jnp.abs(av - bv))))
        else:
            assert jnp.allclose(a, b, atol=1e-4, rtol=1e-4), \
                (name, float(jnp.max(jnp.abs(a - b))))

    print("KERNEL_OK")
</pallas_src>

<mosaic_0001>
module attributes {stable_mosaic.version = 11 : i64} {
  func.func @_probe_kernel(%arg0: i32, %arg1: memref<8x128xf32, #tpu.memory_space<vmem>>, %arg2: memref<8x128xf32, #tpu.memory_space<vmem>>) attributes {dimension_semantics = [#tpu.dimension_semantics<arbitrary>], iteration_bounds = array<i64: 2>, scalar_prefetch = 0 : i64, scratch_operands = 0 : i64, tpu.core_type = #tpu.core_type<tc>, window_params = [{pipeline_mode = #tpu.pipeline_mode<synchronous>, transform_indices = @transform_0, window_bounds = array<i64: 8, 128>}, {transform_indices = @transform_1, window_bounds = array<i64: 8, 128>}]} {
    %c0 = arith.constant 0 : index
    %c0_0 = arith.constant 0 : index
    %0 = vector.load %arg1[%c0, %c0_0] : memref<8x128xf32, #tpu.memory_space<vmem>>, vector<8x128xf32>
    %1 = arith.sitofp %arg0 : i32 to f32
    %2 = vector.broadcast %1 : f32 to vector<8x128xf32>
    %3 = arith.addf %0, %2 : vector<8x128xf32>
    %c0_1 = arith.constant 0 : index
    %c0_2 = arith.constant 0 : index
    %4 = vector.load %arg2[%c0_1, %c0_2] : memref<8x128xf32, #tpu.memory_space<vmem>>, vector<8x128xf32>
    tpu.vector_store %arg2[%c0_1, %c0_2], %3 {strides = array<i32>} : memref<8x128xf32, #tpu.memory_space<vmem>>, vector<8x128xf32>,
    return
  }
  func.func @transform_0(%arg0: i32) -> (i32, i32) {
    %c0_i32 = arith.constant 0 : i32
    %c0_i32_0 = arith.constant 0 : i32
    %c0_i32_1 = arith.constant 0 : i32
    return %c0_i32, %c0_i32_0 : i32, i32
  }
  func.func @transform_1(%arg0: i32) -> (i32, i32) {
    %c0_i32 = arith.constant 0 : i32
    %c0_i32_0 = arith.constant 0 : i32
    return %arg0, %c0_i32 : i32, i32
  }
}

module attributes {stable_mosaic.version = 11 : i64} {
  func.func @fused_kernel(%arg0: i32, %arg1: memref<8x32xf32, #tpu.memory_space<vmem>>, %arg2: memref<32x64xf32, #tpu.memory_space<vmem>>, %arg3: memref<64x64xf32, #tpu.memory_space<vmem>>, %arg4: memref<64x160xf32, #tpu.memory_space<vmem>>, %arg5: memref<160x128xf32, #tpu.memory_space<vmem>>, %arg6: memref<8x256xf32, #tpu.memory_space<vmem>>, %arg7: memref<8x128xf32, #tpu.memory_space<vmem>>) attributes {dimension_semantics = [#tpu.dimension_semantics<parallel>], iteration_bounds = array<i64: 2>, scalar_prefetch = 0 : i64, scratch_operands = 0 : i64, tpu.core_type = #tpu.core_type<tc>, window_params = [{transform_indices = @transform_0, window_bounds = array<i64: 8, 32>}, {pipeline_mode = #tpu.pipeline_mode<synchronous>, transform_indices = @transform_1, window_bounds = array<i64: 32, 64>}, {pipeline_mode = #tpu.pipeline_mode<synchronous>, transform_indices = @transform_2, window_bounds = array<i64: 64, 64>}, {pipeline_mode = #tpu.pipeline_mode<synchronous>, transform_indices = @transform_3, window_bounds = array<i64: 64, 160>}, {pipeline_mode = #tpu.pipeline_mode<synchronous>, transform_indices = @transform_4, window_bounds = array<i64: 160, 128>}, {pipeline_mode = #tpu.pipeline_mode<synchronous>, transform_indices = @transform_5, window_bounds = array<i64: 8, 256>}, {transform_indices = @transform_6, window_bounds = array<i64: 8, 128>}]} {
    %c0 = arith.constant 0 : index
    %c0_0 = arith.constant 0 : index
    %0 = vector.load %arg6[%c0, %c0_0] : memref<8x256xf32, #tpu.memory_space<vmem>>, vector<1x64xf32>
    %c1 = arith.constant 1 : index
    %c0_1 = arith.constant 0 : index
    %1 = vector.load %arg6[%c1, %c0_1] : memref<8x256xf32, #tpu.memory_space<vmem>>, vector<1x64xf32>
    %c2 = arith.constant 2 : index
    %c0_2 = arith.constant 0 : index
    %2 = vector.load %arg6[%c2, %c0_2] : memref<8x256xf32, #tpu.memory_space<vmem>>, vector<1x64xf32>
    %c3 = arith.constant 3 : index
    %c0_3 = arith.constant 0 : index
    %3 = vector.load %arg6[%c3, %c0_3] : memref<8x256xf32, #tpu.memory_space<vmem>>, vector<1x64xf32>
    %c4 = arith.constant 4 : index
    %c0_4 = arith.constant 0 : index
    %4 = vector.load %arg6[%c4, %c0_4] : memref<8x256xf32, #tpu.memory_space<vmem>>, vector<1x64xf32>
    %c5 = arith.constant 5 : index
    %c0_5 = arith.constant 0 : index
    %5 = vector.load %arg6[%c5, %c0_5] : memref<8x256xf32, #tpu.memory_space<vmem>>, vector<1x64xf32>
    %c6 = arith.constant 6 : index
    %c0_6 = arith.constant 0 : index
    %6 = vector.load %arg6[%c6, %c0_6] : memref<8x256xf32, #tpu.memory_space<vmem>>, vector<1x160xf32>
    %c7 = arith.constant 7 : index
    %c0_7 = arith.constant 0 : index
    %7 = vector.load %arg6[%c7, %c0_7] : memref<8x256xf32, #tpu.memory_space<vmem>>, vector<1x128xf32>
    %c0_8 = arith.constant 0 : index
    %c0_9 = arith.constant 0 : index
    %8 = vector.load %arg1[%c0_8, %c0_9] : memref<8x32xf32, #tpu.memory_space<vmem>>, vector<8x32xf32>
    %c0_10 = arith.constant 0 : index
    %c0_11 = arith.constant 0 : index
    %9 = vector.load %arg2[%c0_10, %c0_11] : memref<32x64xf32, #tpu.memory_space<vmem>>, vector<32x64xf32>
    %cst = arith.constant dense<0.000000e+00> : vector<8x64xf32>
    %10 = tpu.matmul %8, %9, %cst {dimension_numbers = #tpu.dot_dimension_numbers<[1], [0], [0], [1], [0, 0, 1, 1], [], []>} : vector<8x32xf32>, vector<32x64xf32>, vector<8x64xf32> -> vector<8x64xf32>
    %11 = vector.broadcast %0 : vector<1x64xf32> to vector<8x64xf32>
    %12 = arith.addf %10, %11 : vector<8x64xf32>
    %cst_12 = arith.constant dense<0.000000e+00> : vector<8xf32>
    %13 = vector.multi_reduction <add>, %12, %cst_12 [1] : vector<8x64xf32> to vector<8xf32>
    %14 = vector.shape_cast %13 : vector<8xf32> to vector<8x1xf32>
    %cst_13 = arith.constant 1.562500e-02 : f32
    %15 = vector.broadcast %cst_13 : f32 to vector<8x1xf32>
    %16 = arith.mulf %14, %15 : vector<8x1xf32>
    %17 = arith.mulf %12, %12 : vector<8x64xf32>
    %cst_14 = arith.constant dense<0.000000e+00> : vector<8xf32>
    %18 = vector.multi_reduction <add>, %17, %cst_14 [1] : vector<8x64xf32> to vector<8xf32>
    %19 = vector.shape_cast %18 : vector<8xf32> to vector<8x1xf32>
    %cst_15 = arith.constant 1.562500e-02 : f32
    %20 = vector.broadcast %cst_15 : f32 to vector<8x1xf32>
    %21 = arith.mulf %19, %20 : vector<8x1xf32>
    %22 = arith.mulf %16, %16 : vector<8x1xf32>
    %23 = arith.subf %21, %22 : vector<8x1xf32>
    %cst_16 = arith.constant 0.000000e+00 : f32
    %24 = vector.broadcast %cst_16 : f32 to vector<8x1xf32>
    %25 = arith.maximumf %23, %24 : vector<8x1xf32>
    %26 = vector.broadcast %16 : vector<8x1xf32> to vector<8x64xf32>
    %27 = arith.subf %12, %26 : vector<8x64xf32>
    %cst_17 = arith.constant 9.99999974E-6 : f32
    %28 = vector.broadcast %cst_17 : f32 to vector<8x1xf32>
    %29 = arith.addf %25, %28 : vector<8x1xf32>
    %30 = math.rsqrt %29 : vector<8x1xf32>
    %31 = vector.broadcast %30 : vector<8x1xf32> to vector<8x64xf32>
    %32 = arith.mulf %27, %31 : vector<8x64xf32>
    %33 = vector.broadcast %1 : vector<1x64xf32> to vector<8x64xf32>
    %34 = arith.mulf %32, %33 : vector<8x64xf32>
    %35 = vector.broadcast %2 : vector<1x64xf32> to vector<8x64xf32>
    %36 = arith.addf %34, %35 : vector<8x64xf32>
    %cst_18 = arith.constant 0.000000e+00 : f32
    %37 = vector.broadcast %cst_18 : f32 to vector<8x64xf32>
    %38 = arith.maximumf %36, %37 : vector<8x64xf32>
    %c0_19 = arith.constant 0 : index
    %c0_20 = arith.constant 0 : index
    %39 = vector.load %arg3[%c0_19, %c0_20] : memref<64x64xf32, #tpu.memory_space<vmem>>, vector<64x64xf32>
    %cst_21 = arith.constant dense<0.000000e+00> : vector<8x64xf32>
    %40 = tpu.matmul %38, %39, %cst_21 {dimension_numbers = #tpu.dot_dimension_numbers<[1], [0], [0], [1], [0, 0, 1, 1], [], []>} : vector<8x64xf32>, vector<64x64xf32>, vector<8x64xf32> -> vector<8x64xf32>
    %41 = vector.broadcast %3 : vector<1x64xf32> to vector<8x64xf32>
    %42 = arith.addf %40, %41 : vector<8x64xf32>
    %cst_22 = arith.constant dense<0.000000e+00> : vector<8xf32>
    %43 = vector.multi_reduction <add>, %42, %cst_22 [1] : vector<8x64xf32> to vector<8xf32>
    %44 = vector.shape_cast %43 : vector<8xf32> to vector<8x1xf32>
    %cst_23 = arith.constant 1.562500e-02 : f32
    %45 = vector.broadcast %cst_23 : f32 to vector<8x1xf32>
    %46 = arith.mulf %44, %45 : vector<8x1xf32>
    %47 = arith.mulf %42, %42 : vector<8x64xf32>
    %cst_24 = arith.constant dense<0.000000e+00> : vector<8xf32>
    %48 = vector.multi_reduction <add>, %47, %cst_24 [1] : vector<8x64xf32> to vector<8xf32>
    %49 = vector.shape_cast %48 : vector<8xf32> to vector<8x1xf32>
    %cst_25 = arith.constant 1.562500e-02 : f32
    %50 = vector.broadcast %cst_25 : f32 to vector<8x1xf32>
    %51 = arith.mulf %49, %50 : vector<8x1xf32>
    %52 = arith.mulf %46, %46 : vector<8x1xf32>
    %53 = arith.subf %51, %52 : vector<8x1xf32>
    %cst_26 = arith.constant 0.000000e+00 : f32
    %54 = vector.broadcast %cst_26 : f32 to vector<8x1xf32>
    %55 = arith.maximumf %53, %54 : vector<8x1xf32>
    %56 = vector.broadcast %46 : vector<8x1xf32> to vector<8x64xf32>
    %57 = arith.subf %42, %56 : vector<8x64xf32>
    %cst_27 = arith.constant 9.99999974E-6 : f32
    %58 = vector.broadcast %cst_27 : f32 to vector<8x1xf32>
    %59 = arith.addf %55, %58 : vector<8x1xf32>
    %60 = math.rsqrt %59 : vector<8x1xf32>
    %61 = vector.broadcast %60 : vector<8x1xf32> to vector<8x64xf32>
    %62 = arith.mulf %57, %61 : vector<8x64xf32>
    %63 = vector.broadcast %4 : vector<1x64xf32> to vector<8x64xf32>
    %64 = arith.mulf %62, %63 : vector<8x64xf32>
    %65 = vector.broadcast %5 : vector<1x64xf32> to vector<8x64xf32>
    %66 = arith.addf %64, %65 : vector<8x64xf32>
    %cst_28 = arith.constant 0.000000e+00 : f32
    %67 = vector.broadcast %cst_28 : f32 to vector<8x64xf32>
    %68 = arith.maximumf %66, %67 : vector<8x64xf32>
    %c0_29 = arith.constant 0 : index
    %c0_30 = arith.constant 0 : index
    %69 = vector.load %arg4[%c0_29, %c0_30] : memref<64x160xf32, #tpu.memory_space<vmem>>, vector<64x160xf32>
    %cst_31 = arith.constant dense<0.000000e+00> : vector<8x160xf32>
    %70 = tpu.matmul %68, %69, %cst_31 {dimension_numbers = #tpu.dot_dimension_numbers<[1], [0], [0], [1], [0, 0, 1, 1], [], []>} : vector<8x64xf32>, vector<64x160xf32>, vector<8x160xf32> -> vector<8x160xf32>
    %71 = vector.broadcast %6 : vector<1x160xf32> to vector<8x160xf32>
    %72 = arith.addf %70, %71 : vector<8x160xf32>
    %cst_32 = arith.constant 0.000000e+00 : f32
    %73 = vector.broadcast %cst_32 : f32 to vector<8x160xf32>
    %74 = arith.maximumf %72, %73 : vector<8x160xf32>
    %c0_33 = arith.constant 0 : index
    %c0_34 = arith.constant 0 : index
    %75 = vector.load %arg5[%c0_33, %c0_34] : memref<160x128xf32, #tpu.memory_space<vmem>>, vector<160x128xf32>
    %cst_35 = arith.constant dense<0.000000e+00> : vector<8x128xf32>
    %76 = tpu.matmul %74, %75, %cst_35 {dimension_numbers = #tpu.dot_dimension_numbers<[1], [0], [0], [1], [0, 0, 1, 1], [], []>} : vector<8x160xf32>, vector<160x128xf32>, vector<8x128xf32> -> vector<8x128xf32>
    %77 = vector.broadcast %7 : vector<1x128xf32> to vector<8x128xf32>
    %78 = arith.addf %76, %77 : vector<8x128xf32>
    %79 = tpu.iota {dimensions = array<i32: 1>} : vector<8x128xi32>
    %false = arith.constant false
    %80 = vector.broadcast %false : i1 to vector<8x128xi1>
    %c8_i32 = arith.constant 8 : i32
    %81 = vector.broadcast %c8_i32 : i32 to vector<8x128xi32>
    %82 = arith.cmpi sge, %79, %81 : vector<8x128xi32>
    %c12_i32 = arith.constant 12 : i32
    %83 = vector.broadcast %c12_i32 : i32 to vector<8x128xi32>
    %84 = arith.cmpi slt, %79, %83 : vector<8x128xi32>
    %85 = arith.andi %82, %84 : vector<8x128xi1>
    %86 = arith.ori %80, %85 : vector<8x128xi1>
    %c18_i32 = arith.constant 18 : i32
    %87 = vector.broadcast %c18_i32 : i32 to vector<8x128xi32>
    %88 = arith.cmpi sge, %79, %87 : vector<8x128xi32>
    %c19_i32 = arith.constant 19 : i32
    %89 = vector.broadcast %c19_i32 : i32 to vector<8x128xi32>
    %90 = arith.cmpi slt, %79, %89 : vector<8x128xi32>
    %91 = arith.andi %88, %90 : vector<8x128xi1>
    %92 = arith.ori %86, %91 : vector<8x128xi1>
    %93 = arith.negf %78 : vector<8x128xf32>
    %94 = math.exp %93 : vector<8x128xf32>
    %cst_36 = arith.constant 1.000000e+00 : f32
    %95 = vector.broadcast %cst_36 : f32 to vector<8x128xf32>
    %96 = arith.addf %95, %94 : vector<8x128xf32>
    %97 = arith.divf %95, %96 : vector<8x128xf32>
    %98 = arith.select %92, %97, %78 : vector<8x128xi1>, vector<8x128xf32>
    %c0_37 = arith.constant 0 : index
    %c0_38 = arith.constant 0 : index
    %99 = vector.load %arg7[%c0_37, %c0_38] : memref<8x128xf32, #tpu.memory_space<vmem>>, vector<8x128xf32>
    tpu.vector_store %arg7[%c0_37, %c0_38], %98 {strides = array<i32>} : memref<8x128xf32, #tpu.memory_space<vmem>>, vector<8x128xf32>,
    %100 = vector.extract_strided_slice %78 {offsets = [0, 2], sizes = [8, 3], strides = [1, 1]} : vector<8x128xf32> to vector<8x3xf32>
    %cst_39 = arith.constant dense<0xFF800000> : vector<8xf32>
    %101 = vector.multi_reduction <maximumf>, %100, %cst_39 [1] : vector<8x3xf32> to vector<8xf32>
    %102 = vector.shape_cast %101 : vector<8xf32> to vector<8x1xf32>
    %103 = vector.broadcast %102 : vector<8x1xf32> to vector<8x3xf32>
    %104 = arith.subf %100, %103 : vector<8x3xf32>
    %105 = math.exp %104 : vector<8x3xf32>
    %cst_40 = arith.constant dense<0.000000e+00> : vector<8xf32>
    %106 = vector.multi_reduction <add>, %105, %cst_40 [1] : vector<8x3xf32> to vector<8xf32>
    %107 = vector.shape_cast %106 : vector<8xf32> to vector<8x1xf32>
    %108 = vector.broadcast %107 : vector<8x1xf32> to vector<8x3xf32>
    %109 = arith.divf %105, %108 : vector<8x3xf32>
    %c0_41 = arith.constant 0 : index
    %c5_42 = arith.constant 5 : index
    %110 = vector.load %arg7[%c0_41, %c5_42] : memref<8x128xf32, #tpu.memory_space<vmem>>, vector<8x3xf32>
    tpu.vector_store %arg7[%c0_41, %c5_42], %109 {strides = array<i32>} : memref<8x128xf32, #tpu.memory_space<vmem>>, vector<8x3xf32>,
    %111 = vector.extract_strided_slice %98 {offsets = [0, 8], sizes = [8, 4], strides = [1, 1]} : vector<8x128xf32> to vector<8x4xf32>
    %cst_43 = arith.constant 1.000000e+00 : f32
    %112 = vector.broadcast %cst_43 : f32 to vector<8x1xf32>
    %cst_44 = arith.constant 0.000000e+00 : f32
    %113 = vector.broadcast %cst_44 : f32 to vector<8x1xf32>
    %114 = tpu.concatenate %112, %111 in 1 : vector<8x1xf32>, vector<8x4xf32> -> vector<8x5xf32>
    %115 = tpu.concatenate %111, %113 in 1 : vector<8x4xf32>, vector<8x1xf32> -> vector<8x5xf32>
    %116 = arith.subf %114, %115 : vector<8x5xf32>
    %c0_45 = arith.constant 0 : index
    %c12 = arith.constant 12 : index
    %117 = vector.load %arg7[%c0_45, %c12] : memref<8x128xf32, #tpu.memory_space<vmem>>, vector<8x5xf32>
    tpu.vector_store %arg7[%c0_45, %c12], %116 {strides = array<i32>} : memref<8x128xf32, #tpu.memory_space<vmem>>, vector<8x5xf32>,
    %118 = tpu.iota {dimensions = array<i32: 1>} : vector<8x5xi32>
    %cst_46 = arith.constant dense<0xFF800000> : vector<8xf32>
    %119 = vector.multi_reduction <maximumf>, %116, %cst_46 [1] : vector<8x5xf32> to vector<8xf32>
    %120 = vector.shape_cast %119 : vector<8xf32> to vector<8x1xf32>
    %121 = vector.broadcast %120 : vector<8x1xf32> to vector<8x5xf32>
    %122 = arith.cmpf oeq, %116, %121 : vector<8x5xf32>
    %c5_i32 = arith.constant 5 : i32
    %123 = vector.broadcast %c5_i32 : i32 to vector<8x5xi32>
    %124 = arith.select %122, %118, %123 : vector<8x5xi1>, vector<8x5xi32>
    %cst_47 = arith.constant dense<2147483647> : vector<8xi32>
    %125 = vector.multi_reduction <minsi>, %124, %cst_47 [1] : vector<8x5xi32> to vector<8xi32>
    %126 = vector.shape_cast %125 : vector<8xi32> to vector<8x1xi32>
    %127 = arith.sitofp %126 : vector<8x1xi32> to vector<8x1xf32>
    %c0_48 = arith.constant 0 : index
    %c17 = arith.constant 17 : index
    %128 = vector.load %arg7[%c0_48, %c17] : memref<8x128xf32, #tpu.memory_space<vmem>>, vector<8x1xf32>
    tpu.vector_store %arg7[%c0_48, %c17], %127 {strides = array<i32>} : memref<8x128xf32, #tpu.memory_space<vmem>>, vector<8x1xf32>,
    return
  }
  func.func @transform_0(%arg0: i32) -> (i32, i32) {
    %c0_i32 = arith.constant 0 : i32
    %c0_i32_0 = arith.constant 0 : i32
    return %arg0, %c0_i32 : i32, i32
  }
  func.func @transform_1(%arg0: i32) -> (i32, i32) {
    %c0_i32 = arith.constant 0 : i32
    %c0_i32_0 = arith.constant 0 : i32
    %c0_i32_1 = arith.constant 0 : i32
    return %c0_i32, %c0_i32_0 : i32, i32
  }
  func.func @transform_2(%arg0: i32) -> (i32, i32) {
    %c0_i32 = arith.constant 0 : i32
    %c0_i32_0 = arith.constant 0 : i32
    %c0_i32_1 = arith.constant 0 : i32
    return %c0_i32, %c0_i32_0 : i32, i32
  }
  func.func @transform_3(%arg0: i32) -> (i32, i32) {
    %c0_i32 = arith.constant 0 : i32
    %c0_i32_0 = arith.constant 0 : i32
    %c0_i32_1 = arith.constant 0 : i32
    return %c0_i32, %c0_i32_0 : i32, i32
  }
  func.func @transform_4(%arg0: i32) -> (i32, i32) {
    %c0_i32 = arith.constant 0 : i32
    %c0_i32_0 = arith.constant 0 : i32
    %c0_i32_1 = arith.constant 0 : i32
    return %c0_i32, %c0_i32_0 : i32, i32
  }
  func.func @transform_5(%arg0: i32) -> (i32, i32) {
    %c0_i32 = arith.constant 0 : i32
    %c0_i32_0 = arith.constant 0 : i32
    %c0_i32_1 = arith.constant 0 : i32
    return %c0_i32, %c0_i32_0 : i32, i32
  }
  func.func @transform_6(%arg0: i32) -> (i32, i32) {
    %c0_i32 = arith.constant 0 : i32
    %c0_i32_0 = arith.constant 0 : i32
    return %arg0, %c0_i32 : i32, i32
  }
}

</mosaic_0001>

<bundles_post_ra>
// kernel: tpu_custom_call.1
= control target key start
LH: loop header
LB: loop body
LE: loop exit
PB: predicated region body
PF: predicated region fallthrough
CT: control target
= control target key end

     0   :  { %6 = vsyncpa [#allocation3], 0  ;;  %s485_s0 = inlined_call_operand.hbm [shape: f32[8,128], index: 0, kind: input, shape index: {}]   ;;  %s486_s1 = inlined_call_operand.hbm [shape: f32[16,128], index: 1, kind: output, shape index: {}]  }
   0x1   :  { %7 = vsyncpa [#allocation4], 0 }
   0x2   :  { %9 = vsyncpa [#allocation4 + $0x1], 0  ;;  %s354_s6 = smov 0   ;;  %s356_s7 = smov 0  }
   0x3   :  { %s358_s8 = smov 0   ;;  %s360_s9 = smov 0  }
   0x4 LB: > { %s375_s10 = sadd.s32 4294967295, %s340_s9   ;;  %s186_s11 = sadd.s32 4294967294, %s340_s9   ;;  %s340_s9 = sphi %s360_s9, %s502_s9   ;;  %s336_s8 = sphi %s358_s8, %s501_s8   ;;  %s332_s7 = sphi %s356_s7, %s500_s7   ;;  %s328_s6 = sphi %s354_s6, %s499_s6  }
   0x5   : > { %s379_s12 = sadd.s32 1, %s340_s9   ;;  %s43_s13 = sadd.s32 1, %s336_s8 }
   0x6   : > { %s40_s14 = ssub.s32 %s340_s9, %s379_s12  ;;  %p53_p0 = scmp.ne.s32.totalorder %s336_s8, %s332_s7 }
   0x7   : > { %p41_p1 = scmp.eq.s32.totalorder %s40_s14, 0  ;;  %p54_p2 = scmp.eq.s32.totalorder %s375_s10, 1 }
   0x8   : > { %p59_p3 = scmp.ne.s32.totalorder %s332_s7, %s328_s6  ;;  %p60_p4 = scmp.eq.s32.totalorder %s186_s11, 1 }
   0x9   : > { %s390_s15 = scalar_select %p41_p1, %s336_s8, %s43_s13  }
   0xa   : > { %p392_p5 = por %p54_p2, %p53_p0  ;;  %p396_p6 = por %p60_p4, %p59_p3 }
   0xb   : > { %p187_p7 = scmp.ge.s32.totalorder %s340_s9, 1  ;;  %p67_p8 = scmp.lt.s32.totalorder %s340_s9, 3 }
   0xc   : > { %s490_s16 = scalar_select %p392_p5, 1, 0 }
   0xd   : > { %s491_s17 = scalar_select %p396_p6, 1, 0 }
   0xe   : > { %p487_p9 = scmp.eq.s32.totalorder %s375_s10, 0  ;;  %p403_p10 = pnand %p187_p7, %p67_p8 }
   0xf   : > { %s342_s19 = smov [#allocation2]   ;;  %s246_s24 = scalar_lea.hbm %s485_s0, 128 }
  0x10   : > { %s492_s18 = scalar_select %p403_p10, 1, 0 }
  0x11   : > { %s80_s20 = sshll.u32 %s342_s19, 4  ;;  %p202_p11 = pneg %p403_p10  ;;  %s81_s20 = int_to_ptr.vmem [resolvable:$true] %s80_s20 }
  0x12   : > { %p247_p13 = scmp.ne.s32.totalorder %s485_s0, %s246_s24  ;;  %p253_p3 = scmp.lt.u32.totalorder %s246_s24, %s485_s0 }
  0x13   : > { %p411_p12 = pnand %p487_p9, %p202_p11 }
  0x15   : > { %p248_p0 = pneg %p411_p12 }
  0x17   : > { %p249_p1 = pnand %p248_p0, %p247_p13 }
  0x19   : > { %p250_p2 = pneg %p249_p1 }
  0x1b   : > { %p255_p4 = pnand %p253_p3, %p250_p2 }
  0x1d   : > { %258 = shalt.err (!%p255_p4)
}
  0x1e   : > { %s259_s29 = scalar_lea.vmem %s81_s20, 128  ;;  %p267_p9 = scmp.lt.s32.totalorder %s81_s20, %s81_s20 }
  0x1f   : > { %p260_p7 = scmp.ne.s32.totalorder %s81_s20, %s259_s29  ;;  %p268_p6 = scmp.lt.s32.totalorder %s259_s29, %s259_s29 }
  0x21   : > { %p262_p8 = pnand %p260_p7, %p248_p0  ;;  %p269_p5 = por %p268_p6, %p267_p9 }
  0x23   : > { %p263_p11 = pneg %p262_p8 }
  0x25   : > { %p270_p10 = pnand %p269_p5, %p263_p11 }
  0x27   : > { %273 = shalt.err (!%p270_p10)
}
  0x28   : > { %205 = dma.hbm_to_vmem [thread:$0]  (!%p411_p12), %s485_s0, 128, %s81_s20, [#allocation3]  }
  0x29   : > { %p494_p13 = scmp.ne.s32.totalorder %s492_s18, 0 }
  0x2a   : > { %p495_p1 = scmp.eq.s32.totalorder (!%p494_p13), %s375_s10, 0 }
  0x2b   : > { %93 = sbr.rel (%p494_p13) target bundleno = 78 (0x4e), region = 24 }
  0x32   : > { %319 = dma.done.wait (%p495_p1), [#allocation3], 128   ;;  %p496_p0 = pmov %p495_p1 }
  0x33   : > { %s105_s3 = sand.u32 1, %s332_s7   ;;  %s109_s5 = scvt.s32.f32 %s375_s10  ;;  %v108_v1 = vld [vmem:[#allocation2] sm:$0xff] }
  0x34   : > { %321 = vsyncadd (%p496_p0), [#allocation3], 4294967168  ;;  %s191_s4 = sshll.u32 %s105_s3, 3  ;;  %s193_s14 = sshll.u32 %s375_s10, 7 }
  0x35   : > { %v110_v0 = vstv %s109_s5  ;;  %s107_s11 = scalar_lea.vmem [#allocation5], %s191_s4  ;;  %s445_s20 = scalar_lea.hbm %s486_s1, %s193_s14 }
  0x36   : > { %s127_s13 = sshll.u32 %s107_s11, 4  ;;  %v111_v2 = vadd.f32 %v110_v0, %v108_v1  ;;  %s114_s21 = scalar_lea.sflag [#allocation4], %s105_s3  ;;  %s440_s13 = int_to_ptr.vmem [resolvable:$true] %s127_s13 }
  0x37   : > { %s274_s22 = scalar_lea.vmem %s440_s13, 128  ;;  %p497_p6 = scmp.ne.s32.totalorder %s490_s16, 0 }
  0x38   : > { %112 = vst [vmem:[%s107_s11] sm:$0xff] %v111_v2  ;;  %p275_p5 = scmp.ne.s32.totalorder %s440_s13, %s274_s22  ;;  %s343_s10 = smov [#allocation5]  }
  0x39   : > { %s278_s23 = sshll.u32 %s343_s10, 4  ;;  %s279_s23 = int_to_ptr.vmem [resolvable:$false] %s278_s23 }
  0x3a   : > { %p276_p9 = pnand %p275_p5, %p497_p6  ;;  %s280_s24 = scalar_lea.vmem %s279_s23, 256 }
  0x3b   : > { %p281_p12 = scmp.lt.s32.totalorder %s440_s13, %s279_s23  ;;  %p282_p2 = scmp.lt.s32.totalorder %s280_s24, %s274_s22 }
  0x3c   : > { %p277_p10 = pneg %p276_p9 }
  0x3d   : > { %p283_p3 = por %p282_p2, %p281_p12 }
  0x3f   : > { %p284_p4 = pnand %p283_p3, %p277_p10 }
  0x41   : > { %287 = shalt.err (!%p284_p4)
}
  0x42   : > { %s288_s25 = scalar_lea.hbm %s445_s20, 128  ;;  %s292_s28 = scalar_lea.hbm %s486_s1, 256 }
  0x43   : > { %p289_p7 = scmp.ne.s32.totalorder %s445_s20, %s288_s25  ;;  %p293_p13 = scmp.lt.u32.totalorder %s445_s20, %s486_s1 }
  0x44   : > { %p294_p1 = scmp.lt.u32.totalorder %s292_s28, %s288_s25  ;;  %p296_p5 = scmp.lt.u32.totalorder %s288_s25, %s445_s20 }
  0x45   : > { %p290_p8 = pnand %p289_p7, %p497_p6 }
  0x46   : > { %p295_p0 = por %p294_p1, %p293_p13 }
  0x47   : > { %p291_p11 = pneg %p290_p8 }
  0x48   : > { %p297_p9 = por %p296_p5, %p295_p0 }
  0x4a   : > { %p298_p10 = pnand %p297_p9, %p291_p11 }
  0x4c   : > { %301 = shalt.err (!%p298_p10)
}
  0x4d   : > { %200 = dma.vmem_to_hbm [thread:$0]  (%p497_p6), %s440_s13, 128, %s445_s20, %s114_s21  }
  0x4e PF: > { %p212_p12 = scmp.ge.s32.totalorder %s340_s9, 2  ;;  %s139_s2 = sand.u32 1, %s328_s6  }
  0x4f   : > { %p498_p2 = scmp.ne.s32.totalorder %s491_s17, 0  ;;  %s140_s3 = scalar_lea.sflag [#allocation4], %s139_s2 }
  0x51   : > { %p207_p3 = pnand %p212_p12, %p498_p2 }
  0x53   : > { %323 = dma.done.wait (!%p207_p3), %s140_s3, 128  }
  0x54   : > { %325 = vsyncadd (!%p207_p3), %s140_s3, 4294967168  ;;  %p12_p4 = scmp.ge.s32.totalorder %s379_s12, 4   ;;  %s499_s6 = smov %s332_s7 }
  0x55   : > { %s500_s7 = smov %s336_s8  ;;  %s501_s8 = smov %s390_s15 }
  0x56   : > { %s502_s9 = smov %s379_s12  ;;  %14 = sbr.rel (!%p12_p4) target bundleno = 4 (0x4), region = 61 }
  0x5d   :  { %145 = vsyncpa [#allocation3], 1 }
  0x5e   :  { %147 = vsyncpa [#allocation3 + $0x1], 1 }
  0x5f   :  { %148 = vsyncpa [#allocation4], 1 }
  0x60   :  { %150 = vsyncpa [#allocation4 + $0x1], 1 }

// kernel: financial_multi_task_forward.1
= control target key start
LH: loop header
LB: loop body
LE: loop exit
PB: predicated region body
PF: predicated region fallthrough
CT: control target
= control target key end

     0   :  { %11 = vsyncpa [#allocation3], 0  ;;  %s1410_s0 = inlined_call_operand.vmem [shape: f32[16,32], index: 0, kind: input, shape index: {}]   ;;  %s1411_s1 = inlined_call_operand.vmem [shape: f32[32,64], index: 1, kind: input, shape index: {}]   ;;  %s1412_s2 = inlined_call_operand.hbm [shape: f32[64,64], index: 2, kind: input, shape index: {}]   ;;  %s1413_s3 = inlined_call_operand.hbm [shape: f32[64,160], index: 3, kind: input, shape index: {}]   ;;  %s1414_s4 = inlined_call_operand.hbm [shape: f32[160,128], index: 4, kind: input, shape index: {}]   ;;  %s1415_s5 = inlined_call_operand.vmem [shape: f32[8,256], index: 5, kind: input, shape index: {}]   ;;  %s1416_s6 = inlined_call_operand.vmem [shape: f32[16,128], index: 6, kind: output, shape index: {}]  }
   0x1   :  { %12 = vsyncpa [#allocation5], 0  ;;  %s1203_s21 = smov 0  }
   0x2 LB: > { %s1153_s22 = smov [#allocation4]   ;;  %s1209_s24 = sadd.s32 4294967295, %s1151_s21   ;;  %s1151_s21 = sphi %s1203_s21, %s18_s21  }
   0x3   : > { %s208_s23 = sshll.u32 %s1153_s22, 4  ;;  %p863_p0 = scmp.ge.s32.totalorder %s1151_s21, 1  ;;  %s1218_s23 = int_to_ptr.vmem [resolvable:$true] %s208_s23 }
   0x4   : > { %p180_p1 = scmp.lt.s32.totalorder %s1151_s21, 3  ;;  %p1417_p2 = scmp.eq.s32.totalorder %s1209_s24, 0 }
   0x5   : > { %s1154_s26 = smov [#allocation2]   ;;  %s1155_s29 = smov [#allocation6]  }
   0x6   : > { %p1214_p3 = pnand %p863_p0, %p180_p1  ;;  %s195_s27 = sshll.u32 %s1154_s26, 4  ;;  %s1222_s27 = int_to_ptr.vmem [resolvable:$true] %s195_s27 }
   0x7   : > { %s1230_s30 = sshll.u32 %s1155_s29, 4  ;;  %s1053_s9 = scalar_lea.hbm %s1413_s3, 2048  ;;  %s222_s30 = int_to_ptr.vmem [resolvable:$true] %s1230_s30 }
   0x8   : > { %s1419_s25 = scalar_select %p1214_p3, 1, 0 }
   0x9   : > { %p1002_p4 = pneg %p1214_p3  ;;  %p1054_p6 = scmp.ne.s32.totalorder %s1413_s3, %s1053_s9 }
   0xa   : > { %p1060_p10 = scmp.lt.u32.totalorder %s1053_s9, %s1413_s3 }
   0xb   : > { %p1226_p5 = pnand %p1417_p2, %p1002_p4 }
   0xd   : > { %p1240_p7 = pneg %p1226_p5 }
   0xf   : > { %p1056_p8 = pnand %p1240_p7, %p1054_p6 }
  0x11   : > { %p1057_p9 = pneg %p1056_p8 }
  0x13   : > { %p1062_p11 = pnand %p1060_p10, %p1057_p9 }
  0x15   : > { %1065 = shalt.err (!%p1062_p11)
}
  0x16   : > { %s1066_s15 = scalar_lea.vmem %s1218_s23, 2048  ;;  %p1074_p1 = scmp.lt.s32.totalorder %s1218_s23, %s1218_s23 }
  0x17   : > { %p1067_p12 = scmp.ne.s32.totalorder %s1218_s23, %s1066_s15  ;;  %p1075_p4 = scmp.lt.s32.totalorder %s1066_s15, %s1066_s15 }
  0x19   : > { %p1069_p13 = pnand %p1067_p12, %p1240_p7  ;;  %p1076_p6 = por %p1075_p4, %p1074_p1 }
  0x1b   : > { %p1070_p0 = pneg %p1069_p13 }
  0x1d   : > { %p1077_p8 = pnand %p1076_p6, %p1070_p0 }
  0x1f   : > { %1080 = shalt.err (!%p1077_p8)
}
  0x20   : > { %s1156_s16 = smov 256   ;;  %s1157_s17 = smov 16  }
  0x21   : > { %1008 = dma.hbm_to_vmem [thread:$0]  (!%p1226_p5), %s1413_s3, 2048, %s1218_s23, [#allocation5], %s1156_s16, %s1156_s16, %s1157_s17  }
  0x22   : > { %s1081_s26 = scalar_lea.hbm %s1412_s2, 1024 }
  0x23   : > { %p1082_p9 = scmp.ne.s32.totalorder %s1412_s2, %s1081_s26  ;;  %p1088_p12 = scmp.lt.u32.totalorder %s1081_s26, %s1412_s2 }
  0x25   : > { %p1084_p10 = pnand %p1082_p9, %p1240_p7 }
  0x27   : > { %p1085_p11 = pneg %p1084_p10 }
  0x29   : > { %p1090_p13 = pnand %p1088_p12, %p1085_p11 }
  0x2b   : > { %1093 = shalt.err (!%p1090_p13)
}
  0x2c   : > { %s1094_s23 = scalar_lea.vmem %s1222_s27, 1024  ;;  %p1102_p6 = scmp.lt.s32.totalorder %s1222_s27, %s1222_s27 }
  0x2d   : > { %p1095_p0 = scmp.ne.s32.totalorder %s1222_s27, %s1094_s23  ;;  %p1103_p8 = scmp.lt.s32.totalorder %s1094_s23, %s1094_s23 }
  0x2f   : > { %p1097_p1 = pnand %p1095_p0, %p1240_p7  ;;  %p1104_p9 = por %p1103_p8, %p1102_p6 }
  0x31   : > { %p1098_p4 = pneg %p1097_p1 }
  0x33   : > { %p1105_p10 = pnand %p1104_p9, %p1098_p4 }
  0x35   : > { %1108 = shalt.err (!%p1105_p10)
}
  0x36   : > { %s1158_s10 = smov 128   ;;  %s1159_s11 = smov 8  }
  0x37   : > { %1005 = dma.hbm_to_vmem [thread:$0]  (!%p1226_p5), %s1412_s2, 1024, %s1222_s27, [#allocation3], %s1158_s10, %s1158_s10, %s1159_s11  }
  0x38   : > { %s1109_s17 = scalar_lea.hbm %s1414_s4, 2560 }
  0x39   : > { %p1110_p11 = scmp.ne.s32.totalorder %s1414_s4, %s1109_s17  ;;  %p1116_p0 = scmp.lt.u32.totalorder %s1109_s17, %s1414_s4 }
  0x3b   : > { %p1112_p12 = pnand %p1110_p11, %p1240_p7 }
  0x3d   : > { %p1113_p13 = pneg %p1112_p12 }
  0x3f   : > { %p1118_p1 = pnand %p1116_p0, %p1113_p13 }
  0x41   : > { %1121 = shalt.err (!%p1118_p1)
}
  0x42   : > { %s1122_s26 = scalar_lea.vmem %s222_s30, 2560  ;;  %p1130_p9 = scmp.lt.s32.totalorder %s222_s30, %s222_s30 }
  0x43   : > { %p1123_p4 = scmp.ne.s32.totalorder %s222_s30, %s1122_s26  ;;  %p1131_p10 = scmp.lt.s32.totalorder %s1122_s26, %s1122_s26 }
  0x45   : > { %p1125_p6 = pnand %p1123_p4, %p1240_p7  ;;  %p1132_p2 = por %p1131_p10, %p1130_p9 }
  0x47   : > { %p1126_p8 = pneg %p1125_p6 }
  0x49   : > { %p1133_p3 = pnand %p1132_p2, %p1126_p8 }
  0x4b   : > { %1136 = shalt.err (!%p1133_p3)
}
  0x4c   : > { %1011 = dma.hbm_to_vmem [thread:$0]  (!%p1226_p5), %s1414_s4, 2560, %s222_s30, [#allocation5], %s1158_s10, %s1158_s10, %s1159_s11  }
  0x4d   : > { %p1422_p11 = scmp.ne.s32.totalorder %s1419_s25, 0 }
  0x4e   : > { %p1423_p12 = scmp.eq.s32.totalorder (!%p1422_p11), %s1209_s24, 0 }
  0x4f   : > { %247 = sbr.rel (%p1422_p11) target bundleno = 1919 (0x77f), region = 44 }
  0x56   : > { %1142 = dma.done.wait (%p1423_p12), [#allocation3], 1024   ;;  %p1424_p7 = pmov %p1423_p12 }
  0x58   : > { %1144 = vsyncadd (%p1424_p7), [#allocation3], 4294966272  ;;  %p1425_p13 = pmov %p1424_p7 }
  0x59   : > { %p1426_p2 = pmov %p1424_p7 }
  0x5a   : > { %1146 = dma.done.wait (%p1425_p13), [#allocation5], 4608  }
  0x5b   : > { %1148 = vsyncadd (%p1426_p2), [#allocation5], 4294962688  ;;  %p283_p3 = scmp.lt.s32.totalorder %s1209_s24, 1  ;;  %v1160_v0 = vmov 0.0|0.0   ;;  %vm1161_vm0 = vmmov 0   ;;  %v1162_v1 = vmov 0.0  }
  0x5c   : > { %926 = vmatprep.subr.bf16.mxu0 %v1160_v0  ;;  %904 = vmatprep.mubr.msk.f32.mxu0 %vm1161_vm0, %v1162_v1  ;;  %v301_v2 = vld [vmem:[%s1411_s1] sm:$0xff]  ;;  %v302_v3 = vld [vmem:[%s1411_s1 + $0x8] sm:$0xff]  ;;  %v303_v4 = vld [vmem:[%s1411_s1 + $0x10] sm:$0xff]  ;;  %vm305_vm1 = vcmask 261120   ;;  %vm379_vm2 = vcmask 523264   ;;  %s1163_s13 = smov 120  }
  0x5d   : > { %960 = vmatprep.subr.bf16.mxu1 %v1160_v0  ;;  %s1428_s24 = smov (!%p283_p3, %s1209_s24), 1  ;;  %v927_v5 = vpack.c.bf16 %v302_v3, %v301_v2  ;;  %v304_v6 = vld [vmem:[%s1411_s1 + $0x18] sm:$0xff]  ;;  %v291_v9 = vld [vmem:[%s1415_s5] ss:$0 sm:$0xff]  ;;  %v400_v17 = vld [vmem:[#allocation2 + $0x8] sm:$0xff]  ;;  %vm712_vm10 = vcmask 39952  }
  0x5e   : > { %s872_s10 = sshll.u32 %s1428_s24, 3  ;;  %v930_v7 = vpack.c.bf16 %v304_v6, %v303_v4  ;;  %v399_v16 = vld [vmem:[#allocation2] sm:$0xff]  ;;  %v401_v19 = vld [vmem:[#allocation2 + $0x10] sm:$0xff]  ;;  %v402_v20 = vld [vmem:[#allocation2 + $0x18] sm:$0xff]  ;;  %vm744_vm11 = vcmask 31744   ;;  %vm739_vm12 = vcmask 7168  }
  0x5f   : > { %928 = vmatpush3.bf16.msra.mxu0 %v927_v5  ;;  %s286_s14 = scalar_lea.vmem %s1410_s0, %s872_s10  ;;  %v933_v18 = vpack.c.bf16 %v400_v17, %v399_v16  ;;  %v936_v21 = vpack.c.bf16 %v402_v20, %v401_v19  ;;  %v403_v22 = vld [vmem:[#allocation2 + $0x20] sm:$0xff]  ;;  %v404_v23 = vld [vmem:[#allocation2 + $0x28] sm:$0xff]  ;;  %v405_v25 = vld [vmem:[#allocation2 + $0x30] sm:$0xff]  ;;  %s1399_s11 = scalar_lea.vmem %s1416_s6, %s872_s10  ;;  %vm753_vm13 = vcmask 39936   ;;  %vm723_vm15 = vcmask 23552  }
  0x60   : > { %929 = vmatprep.subr.bf16.mxu0 %v1160_v0  ;;  %v300_v8 = vld [vmem:[%s286_s14] sm:$0xff]  ;;  %v939_v24 = vpack.c.bf16 %v404_v23, %v403_v22  ;;  %v406_v26 = vld [vmem:[#allocation2 + $0x38] sm:$0xff]  ;;  %v500_v51 = vld [vmem:[#allocation4 + $0x8] sm:$0xff]  ;;  %s1164_s14 = smov 121   ;;  %s1165_s24 = smov 126  }
  0x61   : > { %v942_v27 = vpack.c.bf16 %v406_v26, %v405_v25  ;;  %v292_v38 = vld [vmem:[%s1415_s5 + $0x1] ss:$0 sm:$0xff]  ;;  %v293_v40 = vld [vmem:[%s1415_s5 + $0x2] ss:$0 sm:$0xff]  ;;  %v294_v44 = vld [vmem:[%s1415_s5 + $0x3] ss:$0 sm:$0xff] }
  0x62   : > { %v502_v52 = vld [vmem:[#allocation4 + $0x18] sm:$0xff]  ;;  %v499_v54 = vld [vmem:[#allocation4] sm:$0xff]  ;;  %v501_v55 = vld [vmem:[#allocation4 + $0x10] sm:$0xff]  ;;  %s1166_s10 = smov 12   ;;  %s1167_s15 = smov 3  }
  0x63   : > { %931 = vmatpush3.bf16.msra.mxu0 %v930_v7  ;;  %v944_v53 = vpack.c.bf16 %v502_v52, %v500_v51  ;;  %v946_v56 = vpack.c.bf16 %v501_v55, %v499_v54  ;;  %v504_v57 = vld [vmem:[#allocation4 + $0x28] sm:$0xff]  ;;  %v506_v58 = vld [vmem:[#allocation4 + $0x38] sm:$0xff]  ;;  %v503_v60 = vld [vmem:[#allocation4 + $0x20] sm:$0xff] }
  0x64   : > { %932 = vmatprep.subr.bf16.mxu0 %v1160_v0  ;;  %v948_v59 = vpack.c.bf16 %v506_v58, %v504_v57  ;;  %v505_v61 = vld [vmem:[#allocation4 + $0x30] sm:$0xff]  ;;  %v508_v63 = vld [vmem:[#allocation4 + $0x48] sm:$0xff]  ;;  %v507_v3 = vld [vmem:[#allocation4 + $0x40] sm:$0xff]  ;;  %v516_v58 = vlaneseq }
  0x65   : > { %v950_v62 = vpack.c.bf16 %v505_v61, %v503_v60  ;;  %v509_v4 = vld [vmem:[#allocation4 + $0x50] sm:$0xff]  ;;  %v512_v6 = vld [vmem:[#allocation4 + $0x68] sm:$0xff]  ;;  %v514_v7 = vld [vmem:[#allocation4 + $0x78] sm:$0xff] }
  0x66   : > { %905 = vmatmul.mubr.msk.f32.vlgmr.msra.gmra.mrb[0].mxu0 %vm305_vm1, %v300_v8  ;;  %v954_v5 = vpack.c.bf16 %v509_v4, %v507_v3  ;;  %v511_v8 = vld [vmem:[#allocation4 + $0x60] sm:$0xff]  ;;  %v605_v16 = vld [vmem:[#allocation6 + $0x18] sm:$0xff]  ;;  %v607_v19 = vld [vmem:[#allocation6 + $0x28] sm:$0xff] }
  0x67   : > { %923 = vmatprep.mubr.msk.f32.mxu0 %vm1161_vm0, %v1162_v1  ;;  %934 = vmatpush3.bf16.msra.mxu0 %v933_v18  ;;  %v606_v18 = vld [vmem:[#allocation6 + $0x20] sm:$0xff]  ;;  %v609_v22 = vld [vmem:[#allocation6 + $0x38] sm:$0xff]  ;;  %v611_v25 = vld [vmem:[#allocation6 + $0x48] sm:$0xff] }
  0x68   : > { %935 = vmatprep.subr.bf16.mxu0 %v1160_v0  ;;  %v967_v20 = vpack.c.bf16 %v607_v19, %v606_v18  ;;  %v619_v54 = vld [vmem:[#allocation6 + $0x88] sm:$0xff] }
  0x69   : > { %v874_v61 = vld [vmem:[%s1415_s5 + $0x6] ss:$8 sm:$0x3] }
  0x6b   : > { %937 = vmatpush3.bf16.msra.mxu0 %v936_v21  ;;  %v608_v21 = vld [vmem:[#allocation6 + $0x30] sm:$0xff] }
  0x6c   : > { %938 = vmatprep.subr.bf16.mxu0 %v1160_v0  ;;  %v970_v23 = vpack.c.bf16 %v609_v22, %v608_v21 }
  0x6f   : > { %940 = vmatpush3.bf16.msra.mxu0 %v939_v24  ;;  %v610_v24 = vld [vmem:[#allocation6 + $0x40] sm:$0xff] }
  0x70   : > { %941 = vmatprep.subr.bf16.mxu0 %v1160_v0  ;;  %v973_v26 = vpack.c.bf16 %v611_v25, %v610_v24 }
  0x73   : > { %943 = vmatpush3.bf16.msra.mxu0 %v942_v27  ;;  %v612_v27 = vld [vmem:[#allocation6 + $0x50] sm:$0xff] }
  0x74   : > { %945 = vmatprep.subr.bf16.mxu0 %v944_v53  ;;  %v618_v53 = vld [vmem:[#allocation6 + $0x80] sm:$0xff] }
  0x75   : > { %v985_v55 = vpack.c.bf16 %v619_v54, %v618_v53 }
 0x139   : > { %v375_v10 = vpop.f32.mrb[0].mxu0 }
 0x13a   : > { %v376_v11 = vadd.f32 %v375_v10, %v291_v9  ;;  %v906_v12 = vpop.f32.mrb[1].mxu0  ;;  %v956_v9 = vpack.c.bf16 %v514_v7, %v512_v6  ;;  %v513_v10 = vld [vmem:[#allocation4 + $0x70] sm:$0xff]  ;;  %v299_v7 = vld [vmem:[%s1415_s5 + $0x7] ss:$0 sm:$0xff] }
 0x13b   : > { %v602_v12 = vld [vmem:[#allocation6] sm:$0xff] }
 0x13c   : > { %v380_v13 = vsel %vm379_vm2, %v376_v11, 0.0  ;;  %v384_v14 = vmul.f32 %v376_v11, %v376_v11 }
 0x13d   : > { %381 = vadd.xlane.f32.xlu0 %v380_v13  ;;  %v603_v13 = vld [vmem:[#allocation6 + $0x8] sm:$0xff] }
 0x13e   : > { %v385_v15 = vsel %vm379_vm2, %v384_v14, 0.0  ;;  %v604_v14 = vld [vmem:[#allocation6 + $0x10] sm:$0xff] }
 0x13f   : > { %v964_v17 = vpack.c.bf16 %v605_v16, %v604_v14 }
 0x141   : > { %386 = vadd.xlane.f32.xlu0 %v385_v15  ;;  %v961_v15 = vpack.c.bf16 %v603_v13, %v602_v12  ;;  %v696_v13 = vand.u32 127, %v516_v58 }
 0x143   : > { %962 = vmatpush1.bf16.msra.mxu1 %v961_v15  ;;  %vm697_vm3 = vcmp.ge.s32.totalorder %v696_v13, 8  ;;  %vm698_vm4 = vcmp.lt.s32.totalorder %v696_v13, 12  ;;  %vm700_vm5 = vcmp.ge.s32.totalorder %v696_v13, 18  ;;  %vm701_vm6 = vcmp.lt.s32.totalorder %v696_v13, 19 }
 0x144   : > { %963 = vmatprep.subr.bf16.mxu1 %v1160_v0  ;;  %vm699_vm7 = vmand %vm697_vm3, %vm698_vm4  ;;  %vm775_vm3 = vcmask 146568  }
 0x145   : > { %vm702_vm8 = vmand %vm700_vm5, %vm701_vm6 }
 0x146   : > { %vm703_vm9 = vmor %vm699_vm7, %vm702_vm8 }
 0x147   : > { %965 = vmatpush1.bf16.msra.mxu1 %v964_v17 }
 0x148   : > { %966 = vmatprep.subr.bf16.mxu1 %v1160_v0 }
 0x14b   : > { %968 = vmatpush1.bf16.msra.mxu1 %v967_v20 }
 0x14c   : > { %969 = vmatprep.subr.bf16.mxu1 %v1160_v0 }
 0x14f   : > { %971 = vmatpush1.bf16.msra.mxu1 %v970_v23 }
 0x150   : > { %972 = vmatprep.subr.bf16.mxu1 %v1160_v0 }
 0x153   : > { %974 = vmatpush1.bf16.msra.mxu1 %v973_v26 }
 0x154   : > { %975 = vmatprep.subr.bf16.mxu1 %v1160_v0 }
 0x1ca   : > { %v382_v28 = vpop.xlane.xlu0 %381 }
 0x1cb   : > { %v383_v29 = vmul.f32 0.015625, %v382_v28  ;;  %v613_v28 = vld [vmem:[#allocation6 + $0x58] sm:$0xff] }
 0x1cd   : > { %v389_v31 = vmul.f32 %v383_v29, %v383_v29  ;;  %v392_v36 = vsub.f32 %v376_v11, %v383_v29  ;;  %v958_v11 = vpack.c.bf16 %v513_v10, %v511_v8  ;;  %v976_v29 = vpack.c.bf16 %v613_v28, %v612_v27 }
 0x1ce   : > { %v387_v30 = vpop.xlane.xlu0 %386 }
 0x1cf   : > { %v388_v32 = vmul.f32 0.015625, %v387_v30  ;;  %v614_v30 = vld [vmem:[#allocation6 + $0x60] sm:$0xff]  ;;  %977 = vmatpush1.bf16.msra.mxu1 %v976_v29 }
 0x1d0   : > { %978 = vmatprep.subr.bf16.mxu1 %v1160_v0 }
 0x1d1   : > { %v390_v33 = vsub.f32 %v388_v32, %v389_v31  ;;  %v615_v31 = vld [vmem:[#allocation6 + $0x68] sm:$0xff] }
 0x1d2   : > { %v979_v32 = vpack.c.bf16 %v615_v31, %v614_v30 }
 0x1d3   : > { %v391_v34 = vmax.f32 %v390_v33, 0.0  ;;  %v616_v33 = vld [vmem:[#allocation6 + $0x70] sm:$0xff] }
 0x1d4   : > { %980 = vmatpush1.bf16.msra.mxu1 %v979_v32 }
 0x1d5   : > { %v393_v35 = vadd.f32 1e-05, %v391_v34  ;;  %v617_v34 = vld [vmem:[#allocation6 + $0x78] sm:$0xff]  ;;  %981 = vmatprep.subr.bf16.mxu1 %v1160_v0 }
 0x1d7   : > { %1041 = vrsqrt.f32 %v393_v35  ;;  %v982_v35 = vpack.c.bf16 %v617_v34, %v616_v33 }
 0x1d9   : > { %983 = vmatpush1.bf16.msra.mxu1 %v982_v35 }
 0x1da   : > { %984 = vmatprep.subr.bf16.mxu1 %v1160_v0 }
 0x1dd   : > { %986 = vmatpush1.bf16.msra.mxu1 %v985_v55 }
 0x1de   : > { %987 = vmatprep.subr.bf16.mxu1 %v1160_v0 }
 0x1e1   : > { %v1042_v37 = vpop.eup %1041 }
 0x1e2   : > { %v395_v39 = vmul.f32 %v1042_v37, %v392_v36 }
 0x1e4   : > { %v396_v41 = vmul.f32 %v395_v39, %v292_v38 }
 0x1e6   : > { %v397_v42 = vadd.f32 %v396_v41, %v293_v40 }
 0x1e8   : > { %v398_v43 = vmax.f32 %v397_v42, 0.0 }
 0x1ea   : > { %924 = vmatmul.mubr.msk.f32.vlgmr.msra.gmra.mrb[2].mxu0 %vm379_vm2, %v398_v43 }
 0x1eb   : > { %593 = vmatprep.mubr.f32.mxu0 %v1162_v1  ;;  %947 = vmatpush1.bf16.msra.mxu0 %v946_v56  ;;  %v510_v1 = vld [vmem:[#allocation4 + $0x58] sm:$0xff] }
 0x1ec   : > { %949 = vmatprep.subr.bf16.mxu0 %v948_v59  ;;  %v952_v2 = vpack.c.bf16 %v510_v1, %v508_v63  ;;  %v621_v56 = vld [vmem:[#allocation6 + $0x98] sm:$0xff]  ;;  %v517_v59 = vshrl.u32 %v516_v58, 7 }
 0x1ee   : > { %v518_v60 = vsub.s32 0, %v517_v59 }
 0x1ef   : > { %951 = vmatpush1.bf16.msra.mxu0 %v950_v62  ;;  %v522_v62 = vsub.s32 1, %v517_v59 }
 0x1f0   : > { %953 = vmatprep.subr.bf16.mxu0 %v952_v2  ;;  %v519_v63 = vrot.slane %v874_v61, %v518_v60 }
 0x1f1   : > { %v523_v1 = vrot.slane %v874_v61, %v522_v62 }
 0x1f3   : > { %955 = vmatpush1.bf16.msra.mxu0 %v954_v5 }
 0x1f4   : > { %957 = vmatprep.subr.bf16.mxu0 %v956_v9 }
 0x1f7   : > { %959 = vmatpush1.bf16.msra.mxu0 %v958_v11 }
 0x2bd   : > { %v476_v45 = vpop.f32.mrb[2].mxu0 }
 0x2be   : > { %v1363_v46 = vadd.f32 %v476_v45, %v294_v44  ;;  %v925_v47 = vpop.f32.mrb[3].mxu0 }
 0x2bf   : > { %v295_v47 = vld [vmem:[%s1415_s5 + $0x4] ss:$0 sm:$0xff] }
 0x2c0   : > { %v480_v48 = vsel %vm379_vm2, %v1363_v46, 0.0  ;;  %v484_v49 = vmul.f32 %v1363_v46, %v1363_v46 }
 0x2c1   : > { %481 = vadd.xlane.f32.xlu1 %v480_v48 }
 0x2c2   : > { %v485_v50 = vsel %vm379_vm2, %v484_v49, 0.0  ;;  %v296_v49 = vld [vmem:[%s1415_s5 + $0x5] ss:$0 sm:$0xff] }
 0x2c5   : > { %486 = vadd.xlane.f32.xlu1 %v485_v50 }
 0x34e   : > { %v482_v36 = vpop.xlane.xlu1 %481 }
 0x34f   : > { %v483_v37 = vmul.f32 0.015625, %v482_v36 }
 0x351   : > { %v489_v39 = vmul.f32 %v483_v37, %v483_v37  ;;  %v492_v44 = vsub.f32 %v1363_v46, %v483_v37  ;;  %v620_v46 = vld [vmem:[#allocation6 + $0x90] sm:$0xff] }
 0x352   : > { %v487_v38 = vpop.xlane.xlu1 %486  ;;  %v988_v57 = vpack.c.bf16 %v621_v56, %v620_v46 }
 0x353   : > { %v488_v40 = vmul.f32 0.015625, %v487_v38 }
 0x354   : > { %989 = vmatpush1.bf16.msra.mxu1 %v988_v57 }
 0x355   : > { %v490_v41 = vsub.f32 %v488_v40, %v489_v39 }
 0x357   : > { %v491_v42 = vmax.f32 %v490_v41, 0.0 }
 0x359   : > { %v493_v43 = vadd.f32 1e-05, %v491_v42 }
 0x35b   : > { %1043 = vrsqrt.f32 %v493_v43 }
 0x365   : > { %v1044_v45 = vpop.eup %1043 }
 0x366   : > { %v495_v48 = vmul.f32 %v1044_v45, %v492_v44 }
 0x368   : > { %v496_v50 = vmul.f32 %v495_v48, %v295_v47 }
 0x36a   : > { %v497_v51 = vadd.f32 %v496_v50, %v296_v49 }
 0x36c   : > { %v498_v52 = vmax.f32 %v497_v51, 0.0 }
 0x36e   : > { %877 = vmatmul.mubr.msk.f32.vlgmr.msra.gmra.mrb[4].mxu0 %vm379_vm2, %v498_v52  ;;  %vm751_vm2 = vcmask 138336  }
 0x441   : > { %v595_v2 = vpop.f32.mrb[4].mxu0 }
 0x442   : > { %v596_v3 = vadd.f32 %v595_v2, %v519_v63  ;;  %v597_v4 = vpop.f32.mrb[5].mxu0 }
 0x443   : > { %v598_v5 = vadd.f32 %v597_v4, %v523_v1 }
 0x444   : > { %v600_v0 = vmax.f32 %v596_v3, 0.0 }
 0x445   : > { %v601_v6 = vmax.f32 %v598_v5, 0.0 }
 0x447   : > { %878 = vmatprep.mubr.msk.f32.mxu1 %vm305_vm1, %v601_v6  ;;  %vm733_vm1 = vcmask 64552  }
 0x448   : > { %690 = vmatmul.mubr.f32.vlgmr.msra.gmra.mrb[0].mxu1 %v600_v0 }
 0x51b   : > { %v691_v8 = vpop.f32.mrb[0].mxu1 }
 0x51c   : > { %v692_v9 = vadd.f32 %v691_v8, %v299_v7  ;;  %v693_v10 = vpop.f32.mrb[1].mxu1 }
 0x51e   : > { %v879_v11 = vmul.f32 -1.442695, %v692_v9  ;;  %v713_v17 = vsel %vm712_vm10, %v692_v9, -inf }
 0x520   : > { %1045 = vpow2.f32 %v879_v11 }
 0x52a   : > { %v1046_v12 = vpop.eup %1045 }
 0x52b   : > { %v707_v14 = vadd.f32 1.0, %v1046_v12 }
 0x52d   : > { %1047 = vrcp.f32 %v707_v14 }
 0x537   : > { %v1048_v15 = vpop.eup %1047 }
 0x538   : > { %v710_v16 = vsel %vm703_vm9, %v1048_v15, %v692_v9 }
 0x539   : > { %741 = vrot.lane.b32.xlu1 %v710_v16, %s1163_s13  ;;  %711 = vst [vmem:[%s1399_s11] sm:$0xff] %v710_v16  ;;  %736 = vrot.lane.b32.xlu0 %v710_v16, %s1164_s14 }
 0x55d   : > { %714 = vmax.xlane.f32.xlu1 %v713_v17 }
 0x5ab   : > { %v742_v18 = vpop.permute.xlu1 %741  ;;  %v737_v19 = vpop.permute.xlu0 %736 }
 0x5ac   : > { %v745_v20 = vsel %vm744_vm11, %v742_v18, 0.0  ;;  %v740_v21 = vsel %vm739_vm12, 1.0, %v737_v19 }
 0x5ad   : > { %v746_v22 = vsub.f32 %v740_v21, %v745_v20 }
 0x5af   : > { %v754_v23 = vsel %vm753_vm13, %v746_v22, -inf }
 0x5b0   : > { %755 = vmax.xlane.f32.xlu0 %v754_v23 }
 0x5ea   : > { %v715_v24 = vpop.xlane.xlu1 %714 }
 0x5eb   : > { %v716_v25 = vsub.f32 %v692_v9, %v715_v24 }
 0x5ed   : > { %v717_v26 = vmul.f32 1.442695, %v716_v25 }
 0x5ef   : > { %1049 = vpow2.f32 %v717_v26 }
 0x5f9   : > { %v1050_v27 = vpop.eup %1049 }
 0x5fa   : > { %720 = vrot.lane.b32.xlu0 %v1050_v27, %s1165_s24 }
 0x5fe   : > { %748 = vrot.lane.b32.xlu0 %v746_v22, %s1166_s10 }
 0x63d   : > { %v756_v28 = vpop.xlane.xlu0 %755 }
 0x63e   : > { %vm757_vm14 = vcmp.eq.f32.partialorder %v746_v22, %v756_v28 }
 0x63f   : > { %v758_v29 = vsel %vm757_vm14, %v696_v13, 5 }
 0x640   : > { %v759_v30 = vsel %vm753_vm13, %v758_v29, 2147483647 }
 0x641   : > { %v761_v31 = vshra.s32 %v759_v30, 16  ;;  %v760_v35 = vand.u32 65535, %v759_v30 }
 0x643   : > { %v763_v32 = vcvt.s32.f32 %v761_v31  ;;  %v762_v37 = vcvt.s32.f32 %v760_v35 }
 0x645   : > { %764 = vmin.xlane.f32.xlu1 %v763_v32 }
 0x66c   : > { %v721_v33 = vpop.permute.xlu0 %720 }
 0x66d   : > { %v724_v34 = vsel %vm723_vm15, %v721_v33, 0.0 }
 0x66e   : > { %725 = vadd.xlane.f32.xlu1 %v724_v34 }
 0x670   : > { %v749_v49 = vpop.permute.xlu0 %748 }
 0x6d2   : > { %v765_v36 = vpop.xlane.xlu1 %764 }
 0x6d3   : > { %vm766_vm0 = vcmp.eq.f32.partialorder %v763_v32, %v765_v36  ;;  %v771_v43 = vcvt.f32.s32 %v765_v36 }
 0x6d4   : > { %v767_v38 = vsel %vm766_vm0, %v762_v37, inf }
 0x6d5   : > { %768 = vmin.xlane.f32.xlu1 %v767_v38  ;;  %v772_v45 = vshll.u32 %v771_v43, 16 }
 0x6fb   : > { %v726_v39 = vpop.xlane.xlu1 %725 }
 0x6fc   : > { %1051 = vrcp.f32 %v726_v39 }
 0x706   : > { %v1052_v40 = vpop.eup %1051 }
 0x707   : > { %v728_v41 = vmul.f32 %v1052_v40, %v1050_v27 }
 0x709   : > { %730 = vrot.lane.b32.xlu1 %v728_v41, %s1167_s15 }
 0x762   : > { %v769_v42 = vpop.xlane.xlu1 %768 }
 0x763   : > { %v770_v44 = vcvt.f32.s32 %v769_v42 }
 0x765   : > { %v773_v47 = vadd.s32 %v772_v45, %v770_v44 }
 0x767   : > { %v774_v50 = vcvt.s32.f32 %v773_v47 }
 0x77b   : > { %v731_v48 = vpop.permute.xlu1 %730 }
 0x77c   : > { %734 = vst.msk [vmem:[%s1399_s11] sm:$0xff] %vm733_vm1, %v731_v48 }
 0x77d   : > { %752 = vst.msk [vmem:[%s1399_s11] sm:$0xff] %vm751_vm2, %v749_v49 }
 0x77e   : > { %776 = vst.msk [vmem:[%s1399_s11] sm:$0xff] %vm775_vm3, %v774_v50 }
 0x77f PF: > { %s18_s21 = sadd.s32 1, %s1151_s21  }
 0x780   : > { %p15_p5 = scmp.ge.s32.totalorder %s18_s21, 4  }
 0x782   :  { %17 = sbr.rel (!%p15_p5) target bundleno = 2 (0x2), region = 88 }
 0x789   :  { %796 = vsyncpa [#allocation3], 1 }
 0x78a   :  { %798 = vsyncpa [#allocation3 + $0x1], 1 }
 0x78b   :  { %799 = vsyncpa [#allocation5], 1 }

</bundles_post_ra>
